<compile_context>
chip_gen: v5e
topology: v5e:2x2
jax: 0.10.0
libtpu: 0.0.40
codegen_flags: <defaults>
</compile_context>

<pallas_src>
import functools

import jax
import jax.numpy as jnp
from jax.experimental import pallas as pl
from jax.experimental.pallas import tpu as pltpu


def _round_up(x: int, m: int) -> int:
    return (x + m - 1) // m * m


def mlp_kernel(x_ref, w1_ref, b1_ref, w2_ref, b2_ref, o_ref):
    # x_ref: [TM, Cp], w1_ref: [Cp, Hp], b1_ref: [1, Hp],
    # w2_ref: [Hp, Cp], b2_ref: [1, Cp], o_ref: [TM, Cp]
    #
    # Matmul operands stay in their native dtype (bf16 stays bf16 on the MXU);
    # accumulation is f32.  Elementwise (bias, GELU) runs in f32 on the VPU/EUP.
    h = jnp.dot(x_ref[...], w1_ref[...], preferred_element_type=jnp.float32)
    h = h + b1_ref[...].astype(jnp.float32)

    # exact GELU (erf formulation) == torch.nn.GELU() default
    h = 0.5 * h * (1.0 + jax.lax.erf(h * 0.7071067811865476))

    y = jnp.dot(h.astype(w2_ref.dtype), w2_ref[...],
                preferred_element_type=jnp.float32)
    y = y + b2_ref[...].astype(jnp.float32)

    # dropout: p = 0.0 -> identity
    # TODO(synk): training-mode dropout with p > 0 would need pltpu.prng_seed /
    #             pltpu.prng_random_bits masking; not needed for p == 0.
    o_ref[...] = y.astype(o_ref.dtype)


@functools.partial(jax.jit, static_argnames=("tm",))
def mlp_forward(x, w1, b1, w2, b2, *, tm: int = 256):
    """x: [B, T, C]; weights stored as [in, out] (i.e. torch Linear weight.T)."""
    B, T, C = x.shape
    H = w1.shape[1]
    M = B * T

    # Pad feature dims to the 128-lane width (lane-dense MXU + unmasked stores),
    # pad the token dim to a multiple of the tile.
    Cp = _round_up(max(C, 128), 128)
    Hp = _round_up(max(H, 128), 128)
    if M < tm:
        tm = _round_up(M, 8)
    Mp = _round_up(M, tm)
    grid_m = Mp // tm

    x2d = x.reshape(M, C)
    if (Mp, Cp) != (M, C):
        x2d = jnp.pad(x2d, ((0, Mp - M), (0, Cp - C)))
    w1p = jnp.pad(w1, ((0, Cp - C), (0, Hp - H))) if (Cp, Hp) != (C, H) else w1
    w2p = jnp.pad(w2, ((0, Hp - H), (0, Cp - C))) if (Hp, Cp) != (H, C) else w2
    b1p = jnp.pad(b1.reshape(1, H), ((0, 0), (0, Hp - H)))
    b2p = jnp.pad(b2.reshape(1, C), ((0, 0), (0, Cp - C)))

    # VMEM budget: resident weights + double-buffered x/out tiles + f32 hidden.
    # TODO(synk): for very large C (>= ~1536 in f32) resident weights exceed
    #             v7x's 64 MiB VMEM; that case needs an H-tiled K-reduction
    #             accumulator (grid axis over H, pl.when init/finalize).
    itemsize = jnp.dtype(x.dtype).itemsize
    w_itemsize = jnp.dtype(w1.dtype).itemsize
    w_bytes = 2 * Cp * Hp * w_itemsize + (Hp + Cp) * w_itemsize
    io_bytes = 2 * 2 * tm * Cp * itemsize          # double-buffered in + out tiles
    hid_bytes = 2 * tm * Hp * 4                    # f32 intermediates / spill slack
    vmem_limit = int(min(max(w_bytes + io_bytes + hid_bytes + (4 << 20),
                             16 << 20), 48 << 20))

    cost = pl.CostEstimate(
        flops=2 * 2 * Mp * Cp * Hp,                # two matmuls
        transcendentals=Mp * Hp,                   # erf in GELU
        bytes_accessed=2 * Mp * Cp * itemsize + w_bytes,
    )

    out = pl.pallas_call(
        mlp_kernel,
        out_shape=jax.ShapeDtypeStruct((Mp, Cp), x.dtype),
        grid_spec=pltpu.PrefetchScalarGridSpec(
            num_scalar_prefetch=0,
            grid=(grid_m,),
            in_specs=[
                pl.BlockSpec((tm, Cp), lambda i: (i, 0)),   # x tile streams over M
                pl.BlockSpec((Cp, Hp), lambda i: (0, 0)),   # w1 VMEM-resident
                pl.BlockSpec((1, Hp), lambda i: (0, 0)),    # b1 VMEM-resident
                pl.BlockSpec((Hp, Cp), lambda i: (0, 0)),   # w2 VMEM-resident
                pl.BlockSpec((1, Cp), lambda i: (0, 0)),    # b2 VMEM-resident
            ],
            out_specs=pl.BlockSpec((tm, Cp), lambda i: (i, 0)),
        ),
        compiler_params=pltpu.CompilerParams(
            dimension_semantics=("parallel",),     # megacore / 2-TC sharding over M
            vmem_limit_bytes=vmem_limit,
        ),
        cost_estimate=cost,
    )(x2d, w1p, b1p, w2p, b2p)

    return out[:M, :C].reshape(B, T, C)


if __name__ == "__main__":
    # config: n_embd=32, bias=True, dropout=0.0
    B, T, C = 2, 8, 32
    H = 4 * C

    key = jax.random.PRNGKey(0)
    kx, kw1, kb1, kw2, kb2 = jax.random.split(key, 5)

    x = jax.random.normal(kx, (B, T, C), dtype=jnp.float32)
    # deterministic "Linear" params; stored [in, out] = torch_weight.T
    w1 = jax.random.normal(kw1, (C, H), dtype=jnp.float32) * 0.02
    b1 = jax.random.normal(kb1, (H,), dtype=jnp.float32) * 0.02
    w2 = jax.random.normal(kw2, (H, C), dtype=jnp.float32) * 0.02
    b2 = jax.random.normal(kb2, (C,), dtype=jnp.float32) * 0.02

    y = mlp_forward(x, w1, b1, w2, b2)
    jax.block_until_ready(y)

    # reference check in plain JAX
    h_ref = x.reshape(-1, C) @ w1 + b1
    h_ref = 0.5 * h_ref * (1.0 + jax.lax.erf(h_ref / jnp.sqrt(2.0)))
    y_ref = (h_ref @ w2 + b2).reshape(B, T, C)
    assert jnp.allclose(y, y_ref, atol=1e-5, rtol=1e-5), "mismatch vs reference"

    print("KERNEL_OK")
</pallas_src>

<mosaic_0001>
module attributes {stable_mosaic.version = 11 : i64} {
  func.func @mlp_kernel(%arg0: i32, %arg1: memref<16x128xf32, #tpu.memory_space<vmem>>, %arg2: memref<128x128xf32, #tpu.memory_space<vmem>>, %arg3: memref<1x128xf32, #tpu.memory_space<vmem>>, %arg4: memref<128x128xf32, #tpu.memory_space<vmem>>, %arg5: memref<1x128xf32, #tpu.memory_space<vmem>>, %arg6: memref<16x128xf32, #tpu.memory_space<vmem>>) attributes {dimension_semantics = [#tpu.dimension_semantics<parallel>], iteration_bounds = array<i64: 1>, scalar_prefetch = 0 : i64, scratch_operands = 0 : i64, tpu.core_type = #tpu.core_type<tc>, window_params = [{transform_indices = @transform_0, window_bounds = array<i64: 16, 128>}, {pipeline_mode = #tpu.pipeline_mode<synchronous>, transform_indices = @transform_1, window_bounds = array<i64: 128, 128>}, {pipeline_mode = #tpu.pipeline_mode<synchronous>, transform_indices = @transform_2, window_bounds = array<i64: 1, 128>}, {pipeline_mode = #tpu.pipeline_mode<synchronous>, transform_indices = @transform_3, window_bounds = array<i64: 128, 128>}, {pipeline_mode = #tpu.pipeline_mode<synchronous>, transform_indices = @transform_4, window_bounds = array<i64: 1, 128>}, {transform_indices = @transform_5, window_bounds = array<i64: 16, 128>}]} {
    %c0 = arith.constant 0 : index
    %c0_0 = arith.constant 0 : index
    %0 = vector.load %arg1[%c0, %c0_0] : memref<16x128xf32, #tpu.memory_space<vmem>>, vector<16x128xf32>
    %c0_1 = arith.constant 0 : index
    %c0_2 = arith.constant 0 : index
    %1 = vector.load %arg2[%c0_1, %c0_2] : memref<128x128xf32, #tpu.memory_space<vmem>>, vector<128x128xf32>
    %cst = arith.constant dense<0.000000e+00> : vector<16x128xf32>
    %2 = tpu.matmul %0, %1, %cst {dimension_numbers = #tpu.dot_dimension_numbers<[1], [0], [0], [1], [0, 0, 1, 1], [], []>} : vector<16x128xf32>, vector<128x128xf32>, vector<16x128xf32> -> vector<16x128xf32>
    %c0_3 = arith.constant 0 : index
    %c0_4 = arith.constant 0 : index
    %3 = vector.load %arg3[%c0_3, %c0_4] : memref<1x128xf32, #tpu.memory_space<vmem>>, vector<1x128xf32>
    %4 = vector.broadcast %3 : vector<1x128xf32> to vector<16x128xf32>
    %5 = arith.addf %2, %4 : vector<16x128xf32>
    %cst_5 = arith.constant 5.000000e-01 : f32
    %6 = vector.broadcast %cst_5 : f32 to vector<16x128xf32>
    %7 = arith.mulf %6, %5 : vector<16x128xf32>
    %cst_6 = arith.constant 0.707106769 : f32
    %8 = vector.broadcast %cst_6 : f32 to vector<16x128xf32>
    %9 = arith.mulf %5, %8 : vector<16x128xf32>
    %10 = math.erf %9 : vector<16x128xf32>
    %cst_7 = arith.constant 1.000000e+00 : f32
    %11 = vector.broadcast %cst_7 : f32 to vector<16x128xf32>
    %12 = arith.addf %11, %10 : vector<16x128xf32>
    %13 = arith.mulf %7, %12 : vector<16x128xf32>
    %c0_8 = arith.constant 0 : index
    %c0_9 = arith.constant 0 : index
    %14 = vector.load %arg4[%c0_8, %c0_9] : memref<128x128xf32, #tpu.memory_space<vmem>>, vector<128x128xf32>
    %cst_10 = arith.constant dense<0.000000e+00> : vector<16x128xf32>
    %15 = tpu.matmul %13, %14, %cst_10 {dimension_numbers = #tpu.dot_dimension_numbers<[1], [0], [0], [1], [0, 0, 1, 1], [], []>} : vector<16x128xf32>, vector<128x128xf32>, vector<16x128xf32> -> vector<16x128xf32>
    %c0_11 = arith.constant 0 : index
    %c0_12 = arith.constant 0 : index
    %16 = vector.load %arg5[%c0_11, %c0_12] : memref<1x128xf32, #tpu.memory_space<vmem>>, vector<1x128xf32>
    %17 = vector.broadcast %16 : vector<1x128xf32> to vector<16x128xf32>
    %18 = arith.addf %15, %17 : vector<16x128xf32>
    %c0_13 = arith.constant 0 : index
    %c0_14 = arith.constant 0 : index
    %19 = vector.load %arg6[%c0_13, %c0_14] : memref<16x128xf32, #tpu.memory_space<vmem>>, vector<16x128xf32>
    tpu.vector_store %arg6[%c0_13, %c0_14], %18 {strides = array<i32>} : memref<16x128xf32, #tpu.memory_space<vmem>>, vector<16x128xf32>,
    return
  }
  func.func @transform_0(%arg0: i32) -> (i32, i32) {
    %c0_i32 = arith.constant 0 : i32
    %c0_i32_0 = arith.constant 0 : i32
    return %arg0, %c0_i32 : i32, i32
  }
  func.func @transform_1(%arg0: i32) -> (i32, i32) {
    %c0_i32 = arith.constant 0 : i32
    %c0_i32_0 = arith.constant 0 : i32
    %c0_i32_1 = arith.constant 0 : i32
    return %c0_i32, %c0_i32_0 : i32, i32
  }
  func.func @transform_2(%arg0: i32) -> (i32, i32) {
    %c0_i32 = arith.constant 0 : i32
    %c0_i32_0 = arith.constant 0 : i32
    %c0_i32_1 = arith.constant 0 : i32
    return %c0_i32, %c0_i32_0 : i32, i32
  }
  func.func @transform_3(%arg0: i32) -> (i32, i32) {
    %c0_i32 = arith.constant 0 : i32
    %c0_i32_0 = arith.constant 0 : i32
    %c0_i32_1 = arith.constant 0 : i32
    return %c0_i32, %c0_i32_0 : i32, i32
  }
  func.func @transform_4(%arg0: i32) -> (i32, i32) {
    %c0_i32 = arith.constant 0 : i32
    %c0_i32_0 = arith.constant 0 : i32
    %c0_i32_1 = arith.constant 0 : i32
    return %c0_i32, %c0_i32_0 : i32, i32
  }
  func.func @transform_5(%arg0: i32) -> (i32, i32) {
    %c0_i32 = arith.constant 0 : i32
    %c0_i32_0 = arith.constant 0 : i32
    return %arg0, %c0_i32 : i32, i32
  }
}

</mosaic_0001>

<bundles_post_ra>
// kernel: mlp_forward.1
= control target key start
LH: loop header
LB: loop body
LE: loop exit
PB: predicated region body
PF: predicated region fallthrough
CT: control target
= control target key end

     0   :  { %s416_s1 = inlined_call_operand.vmem [shape: f32[128,128], index: 1, kind: input, shape index: {}]   ;;  %s417_s2 = inlined_call_operand.vmem [shape: f32[1,128], index: 2, kind: input, shape index: {}]   ;;  %s418_s0 = inlined_call_operand.vmem [shape: f32[16,128], index: 0, kind: input, shape index: {}]   ;;  %s419_s4 = inlined_call_operand.vmem [shape: f32[1,128], index: 4, kind: input, shape index: {}]   ;;  %s420_s3 = inlined_call_operand.vmem [shape: f32[128,128], index: 3, kind: input, shape index: {}]   ;;  %s421_s5 = inlined_call_operand.vmem [shape: f32[16,128], index: 5, kind: output, shape index: {}]  }
   0x1   :  { %v37_v0 = vld [vmem:[%s416_s1 + $0x78] sm:$0xff]  ;;  %v36_v1 = vld [vmem:[%s416_s1 + $0x70] sm:$0xff]  ;;  %v35_v2 = vld [vmem:[%s416_s1 + $0x68] sm:$0xff] }
   0x2   :  { %42 = vmatpush.msra.mxu0 %v37_v0  ;;  %204 = vmatpush.msra.mxu2 %v37_v0  ;;  %v34_v3 = vld [vmem:[%s416_s1 + $0x60] sm:$0xff]  ;;  %v33_v4 = vld [vmem:[%s416_s1 + $0x58] sm:$0xff]  ;;  %v32_v5 = vld [vmem:[%s416_s1 + $0x50] sm:$0xff] }
   0x3   :  { %v31_v6 = vld [vmem:[%s416_s1 + $0x48] sm:$0xff]  ;;  %v30_v7 = vld [vmem:[%s416_s1 + $0x40] sm:$0xff]  ;;  %v29_v8 = vld [vmem:[%s416_s1 + $0x38] sm:$0xff] }
   0x4   :  { %43 = vmatpush.msra.mxu0 %v36_v1  ;;  %205 = vmatpush.msra.mxu2 %v36_v1  ;;  %v28_v9 = vld [vmem:[%s416_s1 + $0x30] sm:$0xff]  ;;  %v27_v10 = vld [vmem:[%s416_s1 + $0x28] sm:$0xff]  ;;  %v26_v11 = vld [vmem:[%s416_s1 + $0x20] sm:$0xff] }
   0x5   :  { %v25_v12 = vld [vmem:[%s416_s1 + $0x18] sm:$0xff]  ;;  %v24_v13 = vld [vmem:[%s416_s1 + $0x10] sm:$0xff]  ;;  %v23_v14 = vld [vmem:[%s416_s1 + $0x8] sm:$0xff] }
   0x6   :  { %44 = vmatpush.msra.mxu0 %v35_v2  ;;  %206 = vmatpush.msra.mxu2 %v35_v2  ;;  %v22_v15 = vld [vmem:[%s416_s1] sm:$0xff]  ;;  %v21_v17 = vld [vmem:[%s418_s0 + $0x8] sm:$0xff]  ;;  %v168_v18 = vld [vmem:[%s420_s3 + $0x78] sm:$0xff] }
   0x7   :  { %v20_v16 = vld [vmem:[%s418_s0] sm:$0xff]  ;;  %173 = vmatpush.msra.mxu1 %v168_v18  ;;  %220 = vmatpush.msra.mxu3 %v168_v18  ;;  %v167_v19 = vld [vmem:[%s420_s3 + $0x70] sm:$0xff]  ;;  %v166_v20 = vld [vmem:[%s420_s3 + $0x68] sm:$0xff] }
   0x8   :  { %45 = vmatpush.msra.mxu0 %v34_v3  ;;  %207 = vmatpush.msra.mxu2 %v34_v3  ;;  %v165_v21 = vld [vmem:[%s420_s3 + $0x60] sm:$0xff]  ;;  %v164_v23 = vld [vmem:[%s420_s3 + $0x58] sm:$0xff]  ;;  %v163_v25 = vld [vmem:[%s420_s3 + $0x50] sm:$0xff] }
   0x9   :  { %174 = vmatpush.msra.mxu1 %v167_v19  ;;  %221 = vmatpush.msra.mxu3 %v167_v19  ;;  %v236_v22 = vld [vmem:[%s417_s2] ss:$0 sm:$0xff]  ;;  %v162_v27 = vld [vmem:[%s420_s3 + $0x48] sm:$0xff]  ;;  %v160_v30 = vld [vmem:[%s420_s3 + $0x38] sm:$0xff] }
   0xa   :  { %46 = vmatpush.msra.mxu0 %v33_v4  ;;  %208 = vmatpush.msra.mxu2 %v33_v4  ;;  %v161_v29 = vld [vmem:[%s420_s3 + $0x40] sm:$0xff]  ;;  %v159_v33 = vld [vmem:[%s420_s3 + $0x30] sm:$0xff]  ;;  %v158_v36 = vld [vmem:[%s420_s3 + $0x28] sm:$0xff] }
   0xb   :  { %175 = vmatpush.msra.mxu1 %v166_v20  ;;  %222 = vmatpush.msra.mxu3 %v166_v20  ;;  %v157_v39 = vld [vmem:[%s420_s3 + $0x20] sm:$0xff]  ;;  %v156_v43 = vld [vmem:[%s420_s3 + $0x18] sm:$0xff]  ;;  %v155_v47 = vld [vmem:[%s420_s3 + $0x10] sm:$0xff] }
   0xc   :  { %47 = vmatpush.msra.mxu0 %v32_v5  ;;  %209 = vmatpush.msra.mxu2 %v32_v5  ;;  %v154_v52 = vld [vmem:[%s420_s3 + $0x8] sm:$0xff]  ;;  %v153_v56 = vld [vmem:[%s420_s3] sm:$0xff] }
   0xd   :  { %176 = vmatpush.msra.mxu1 %v165_v21  ;;  %223 = vmatpush.msra.mxu3 %v165_v21 }
   0xe   :  { %48 = vmatpush.msra.mxu0 %v31_v6  ;;  %210 = vmatpush.msra.mxu2 %v31_v6 }
   0xf   :  { %177 = vmatpush.msra.mxu1 %v164_v23  ;;  %224 = vmatpush.msra.mxu3 %v164_v23 }
  0x10   :  { %49 = vmatpush.msra.mxu0 %v30_v7  ;;  %211 = vmatpush.msra.mxu2 %v30_v7 }
  0x11   :  { %178 = vmatpush.msra.mxu1 %v163_v25  ;;  %225 = vmatpush.msra.mxu3 %v163_v25 }
  0x12   :  { %50 = vmatpush.msra.mxu0 %v29_v8  ;;  %212 = vmatpush.msra.mxu2 %v29_v8 }
  0x13   :  { %179 = vmatpush.msra.mxu1 %v162_v27  ;;  %226 = vmatpush.msra.mxu3 %v162_v27 }
  0x14   :  { %51 = vmatpush.msra.mxu0 %v28_v9  ;;  %213 = vmatpush.msra.mxu2 %v28_v9 }
  0x15   :  { %180 = vmatpush.msra.mxu1 %v161_v29  ;;  %227 = vmatpush.msra.mxu3 %v161_v29 }
  0x16   :  { %52 = vmatpush.msra.mxu0 %v27_v10  ;;  %214 = vmatpush.msra.mxu2 %v27_v10 }
  0x17   :  { %181 = vmatpush.msra.mxu1 %v160_v30  ;;  %228 = vmatpush.msra.mxu3 %v160_v30 }
  0x18   :  { %53 = vmatpush.msra.mxu0 %v26_v11  ;;  %215 = vmatpush.msra.mxu2 %v26_v11 }
  0x19   :  { %182 = vmatpush.msra.mxu1 %v159_v33  ;;  %229 = vmatpush.msra.mxu3 %v159_v33 }
  0x1a   :  { %54 = vmatpush.msra.mxu0 %v25_v12  ;;  %216 = vmatpush.msra.mxu2 %v25_v12 }
  0x1b   :  { %183 = vmatpush.msra.mxu1 %v158_v36  ;;  %230 = vmatpush.msra.mxu3 %v158_v36 }
  0x1c   :  { %55 = vmatpush.msra.mxu0 %v24_v13  ;;  %217 = vmatpush.msra.mxu2 %v24_v13 }
  0x1d   :  { %184 = vmatpush.msra.mxu1 %v157_v39  ;;  %231 = vmatpush.msra.mxu3 %v157_v39 }
  0x1e   :  { %56 = vmatpush.msra.mxu0 %v23_v14  ;;  %218 = vmatpush.msra.mxu2 %v23_v14 }
  0x1f   :  { %185 = vmatpush.msra.mxu1 %v156_v43  ;;  %232 = vmatpush.msra.mxu3 %v156_v43 }
  0x20   :  { %57 = vmatpush.msra.mxu0 %v22_v15  ;;  %219 = vmatpush.msra.mxu2 %v22_v15 }
  0x21   :  { %58 = vmatmul.f32.vlgmr.msra.gmra.mxu0 %v20_v16  ;;  %61 = vmatmul.f32.vlgmr.msra.gmra.mxu2 %v21_v17 }
  0x22   :  { %186 = vmatpush.msra.mxu1 %v155_v47  ;;  %233 = vmatpush.msra.mxu3 %v155_v47 }
  0x24   :  { %187 = vmatpush.msra.mxu1 %v154_v52  ;;  %234 = vmatpush.msra.mxu3 %v154_v52 }
  0x26   :  { %188 = vmatpush.msra.mxu1 %v153_v56  ;;  %235 = vmatpush.msra.mxu3 %v153_v56  ;;  %v237_v56 = vld [vmem:[%s419_s4] ss:$0 sm:$0xff] }
  0x9e   :  { %v59_v24 = vpop.f32.mrf.mxu0 }
  0x9f   :  { %v347_v26 = vadd.f32 %v236_v22, %v59_v24 }
  0xa1   :  { %v353_v28 = vmul.f32 0.70710677, %v347_v26  ;;  %v65_v47 = vmul.f32 0.5, %v347_v26 }
  0xa3   :  { %v69_v31 = vmul.f32 %v353_v28, %v353_v28 }
  0xa4   :  { %v62_v32 = vpop.f32.mrf.mxu2 }
  0xa5   :  { %v366_v34 = vmin.f32 %v69_v31, 16.0  ;;  %v368_v35 = vadd.f32 %v236_v22, %v62_v32 }
  0xa7   :  { %v71_v37 = vmul.f32 2.1237322e-06, %v366_v34  ;;  %v375_v38 = vmul.f32 0.70710677, %v368_v35  ;;  %v82_v40 = vmul.f32 3.8918573e-05, %v366_v34 }
  0xa9   :  { %v72_v41 = vadd.f32 0.00028619796, %v71_v37  ;;  %v109_v42 = vmul.f32 %v375_v38, %v375_v38  ;;  %v83_v44 = vadd.f32 0.001143296, %v82_v40 }
  0xab   :  { %v73_v45 = vmul.f32 %v72_v41, %v366_v34  ;;  %v110_v46 = vmin.f32 %v109_v42, 16.0  ;;  %v84_v48 = vmul.f32 %v83_v44, %v366_v34 }
  0xad   :  { %v111_v49 = vmul.f32 2.1237322e-06, %v110_v46  ;;  %v122_v50 = vmul.f32 3.8918573e-05, %v110_v46  ;;  %v74_v51 = vadd.f32 0.0036580483, %v73_v45 }
  0xae   :  { %v85_v53 = vadd.f32 0.014752088, %v84_v48 }
  0xaf   :  { %v112_v54 = vadd.f32 0.00028619796, %v111_v49  ;;  %v123_v55 = vadd.f32 0.001143296, %v122_v50  ;;  %v75_v60 = vmul.f32 %v74_v51, %v366_v34 }
  0xb0   :  { %v86_v57 = vmul.f32 %v85_v53, %v366_v34  ;;  %v66_v53 = vmul.f32 0.5, %v368_v35 }
  0xb1   :  { %v113_v58 = vmul.f32 %v112_v54, %v110_v46  ;;  %v124_v59 = vmul.f32 %v123_v55, %v110_v46  ;;  %v76_v2 = vadd.f32 0.05243302, %v75_v60 }
  0xb2   :  { %v87_v61 = vadd.f32 0.112945676, %v86_v57 }
  0xb3   :  { %v114_v62 = vadd.f32 0.0036580483, %v113_v58  ;;  %v125_v63 = vadd.f32 0.014752088, %v124_v59  ;;  %v77_v8 = vmul.f32 %v76_v2, %v366_v34 }
  0xb4   :  { %v88_v0 = vmul.f32 %v87_v61, %v366_v34 }
  0xb5   :  { %v126_v1 = vmul.f32 %v125_v63, %v110_v46  ;;  %v115_v4 = vmul.f32 %v114_v62, %v110_v46  ;;  %v78_v13 = vadd.f32 0.18741608, %v77_v8 }
  0xb6   :  { %v89_v3 = vadd.f32 0.4994258, %v88_v0 }
  0xb7   :  { %v127_v5 = vadd.f32 0.112945676, %v126_v1  ;;  %v116_v10 = vadd.f32 0.05243302, %v115_v4  ;;  %v79_v17 = vmul.f32 %v78_v13, %v366_v34 }
  0xb8   :  { %v90_v6 = vmul.f32 %v89_v3, %v366_v34 }
  0xb9   :  { %v128_v7 = vmul.f32 %v127_v5, %v110_v46  ;;  %v117_v14 = vmul.f32 %v116_v10, %v110_v46  ;;  %v80_v21 = vadd.f32 1.1283791, %v79_v17 }
  0xba   :  { %v91_v9 = vadd.f32 1.0, %v90_v6 }
  0xbb   :  { %v129_v11 = vadd.f32 0.4994258, %v128_v7  ;;  %v118_v18 = vadd.f32 0.18741608, %v117_v14  ;;  %v81_v31 = vmul.f32 %v80_v21, %v353_v28 }
  0xbc   :  { %238 = vrcp.f32 %v91_v9  ;;  %v103_v22 = vand.u32 2147483648, %v91_v9  ;;  %v101_v27 = vand.u32 2147483647, %v91_v9  ;;  %vm97_vm1 = vweird.f32 %v91_v9 }
  0xbd   :  { %v130_v12 = vmul.f32 %v129_v11, %v110_v46  ;;  %v119_v24 = vmul.f32 %v118_v18, %v110_v46 }
  0xbe   :  { %v104_v32 = vor.u32 1.1754944e-38, %v103_v22  ;;  %vm102_vm3 = vcmp.eq.f32.partialorder %v101_v27, 8.507059e+37 }
  0xbf   :  { %v131_v15 = vadd.f32 1.0, %v130_v12  ;;  %v120_v36 = vadd.f32 1.1283791, %v119_v24 }
  0xc1   :  { %240 = vrcp.f32 %v131_v15  ;;  %v143_v37 = vand.u32 2147483648, %v131_v15  ;;  %v141_v41 = vand.u32 2147483647, %v131_v15  ;;  %vm137_vm5 = vweird.f32 %v131_v15 }
  0xc2   :  { %v239_v16 = vpop.eup %238  ;;  %v121_v46 = vmul.f32 %v120_v36, %v375_v38 }
  0xc3   :  { %v93_v19 = vmul.f32 %v239_v16, %v91_v9  ;;  %vm98_vm0 = vweird.f32 %v239_v16  ;;  %v144_v45 = vor.u32 1.1754944e-38, %v143_v37  ;;  %vm142_vm7 = vcmp.eq.f32.partialorder %v141_v41, 8.507059e+37 }
  0xc4   :  { %vm99_vm2 = vmor %vm97_vm1, %vm98_vm0 }
  0xc5   :  { %v94_v20 = vsub.f32 1.0, %v93_v19 }
  0xc7   :  { %v241_v23 = vpop.eup %240  ;;  %v95_v25 = vmul.f32 %v239_v16, %v94_v20 }
  0xc8   :  { %v133_v29 = vmul.f32 %v241_v23, %v131_v15  ;;  %vm138_vm4 = vweird.f32 %v241_v23 }
  0xc9   :  { %v96_v30 = vadd.f32 %v239_v16, %v95_v25  ;;  %vm139_vm6 = vmor %vm137_vm5, %vm138_vm4 }
  0xca   :  { %v134_v33 = vsub.f32 1.0, %v133_v29 }
  0xcb   :  { %v100_v34 = vsel %vm99_vm2, %v239_v16, %v96_v30 }
  0xcc   :  { %v105_v39 = vsel %vm102_vm3, %v104_v32, %v100_v34  ;;  %v135_v40 = vmul.f32 %v241_v23, %v134_v33 }
  0xcd   :  { %v106_v42 = vmul.f32 %v105_v39, %v81_v31 }
  0xce   :  { %v136_v43 = vadd.f32 %v241_v23, %v135_v40 }
  0xcf   :  { %v202_v44 = vclamps-f32 %v106_v42, 1.0 }
  0xd0   :  { %v140_v28 = vsel %vm139_vm6, %v241_v23, %v136_v43 }
  0xd1   :  { %v149_v48 = vadd.f32 1.0, %v202_v44  ;;  %v145_v49 = vsel %vm142_vm7, %v144_v45, %v140_v28 }
  0xd2   :  { %v146_v50 = vmul.f32 %v145_v49, %v121_v46 }
  0xd3   :  { %v151_v51 = vmul.f32 %v149_v48, %v65_v47 }
  0xd4   :  { %v203_v52 = vclamps-f32 %v146_v50, 1.0 }
  0xd5   :  { %189 = vmatmul.f32.vlgmr.msra.gmra.mxu1 %v151_v51 }
  0xd6   :  { %v150_v54 = vadd.f32 1.0, %v203_v52 }
  0xd8   :  { %v152_v55 = vmul.f32 %v150_v54, %v66_v53 }
  0xda   :  { %192 = vmatmul.f32.vlgmr.msra.gmra.mxu3 %v152_v55 }
 0x152   :  { %v190_v38 = vpop.f32.mrf.mxu1 }
 0x153   :  { %v191_v57 = vadd.f32 %v237_v56, %v190_v38 }
 0x155   :  { %196 = vst [vmem:[%s421_s5] sm:$0xff] %v191_v57 }
 0x15d   :  { %v193_v26 = vpop.f32.mrf.mxu3 }
 0x15e   :  { %v194_v58 = vadd.f32 %v237_v56, %v193_v26 }
 0x160   :  { %197 = vst [vmem:[%s421_s5 + $0x8] sm:$0xff] %v194_v58 }

</bundles_post_ra>
